<compile_context>
chip_gen: v7x
topology: tpu7x:2x2x1
jax: 0.10.0
libtpu: 0.0.40
codegen_flags: <defaults>
</compile_context>

<pallas_src>
import functools

import jax
import jax.numpy as jnp
from jax.experimental import pallas as pl
from jax.experimental.pallas import tpu as pltpu

_BN_EPS = 1e-5
_L2_EPS = 1e-12


def _stats_kernel(x_ref, w1_ref, params_ref, stats_ref, sum_ref, sq_ref, *, n_rows):
    """Pass 1: per-tile Linear1 + batch-statistics accumulation (full-batch BN stats)."""
    t = pl.program_id(0)

    @pl.when(t == 0)
    def _init():
        sum_ref[...] = jnp.zeros_like(sum_ref)
        sq_ref[...] = jnp.zeros_like(sq_ref)

    b1 = params_ref[0:1, :]                               # (1, H) f32
    h = jnp.dot(x_ref[...], w1_ref[...],                  # bf16 x bf16 -> f32 on MXU
                preferred_element_type=jnp.float32) + b1
    sum_ref[...] += jnp.sum(h, axis=0, keepdims=True)
    sq_ref[...] += jnp.sum(h * h, axis=0, keepdims=True)

    @pl.when(t == pl.num_programs(0) - 1)
    def _finalize():
        inv_n = jnp.float32(1.0 / n_rows)
        mean = sum_ref[...] * inv_n
        var = jnp.maximum(sq_ref[...] * inv_n - mean * mean, 0.0)   # biased variance
        gamma = params_ref[1:2, :]
        beta = params_ref[2:3, :]
        scale = gamma * jax.lax.rsqrt(var + _BN_EPS)      # fold BN into a single FMA
        shift = beta - mean * scale
        stats_ref[0:1, :] = scale
        stats_ref[1:2, :] = shift


def _apply_kernel(x_ref, w1_ref, w2_ref, params_ref, stats_ref, o_ref):
    """Pass 2: Linear1 -> folded BN FMA -> ReLU -> Linear2 -> L2 normalize."""
    b1 = params_ref[0:1, :]
    h = jnp.dot(x_ref[...], w1_ref[...],
                preferred_element_type=jnp.float32) + b1
    h = jnp.maximum(h * stats_ref[0:1, :] + stats_ref[1:2, :], 0.0)
    z = jnp.dot(h.astype(w2_ref.dtype), w2_ref[...],
                preferred_element_type=jnp.float32)
    sumsq = jnp.sum(z * z, axis=1, keepdims=True)
    # z / max(||z||, 1e-12)  ==  z * rsqrt(max(||z||^2, 1e-24))   (rsqrt -> EUP slot)
    o_ref[...] = (z * jax.lax.rsqrt(jnp.maximum(sumsq, _L2_EPS * _L2_EPS))).astype(o_ref.dtype)


def _vmem_limit(nbytes):
    # generous margin over the static buffer estimate, clamped to v7x physical VMEM
    return int(min(max(4 * nbytes, 8 * 1024 * 1024), 64 * 1024 * 1024))


def projection_head(x, w1_t, b1, gamma, beta, w2_t, *,
                    tile_n=128, matmul_dtype=jnp.bfloat16):
    """x: (N, D_in); w1_t: (D_in, H); b1/gamma/beta: (H,); w2_t: (H, D_out)."""
    n, d_in = x.shape
    d_in2, hid = w1_t.shape
    hid2, d_out = w2_t.shape
    assert d_in == d_in2 and hid == hid2

    if n % tile_n != 0:          # fall back to a single tile for awkward batch sizes
        tile_n = n
    nt = n // tile_n

    # MXU operands in bf16 (halves HBM/VMEM traffic); elementwise math stays f32.
    x_c = x.astype(matmul_dtype)
    w1_c = w1_t.astype(matmul_dtype)
    w2_c = w2_t.astype(matmul_dtype)
    # pack the three (H,) parameter vectors into one VMEM-resident (3, H) block
    params = jnp.stack(
        [b1.astype(jnp.float32), gamma.astype(jnp.float32), beta.astype(jnp.float32)],
        axis=0)

    isz = jnp.dtype(matmul_dtype).itemsize
    w1_b = d_in * hid * isz
    w2_b = hid * d_out * isz
    x_tile_b = tile_n * d_in * isz
    h_tile_b = tile_n * hid * 4
    small_b = (3 + 2 + 2) * hid * 4
    stats_vmem = _vmem_limit(2 * (x_tile_b + w1_b) + h_tile_b + small_b)
    apply_vmem = _vmem_limit(2 * (x_tile_b + w1_b + w2_b + tile_n * d_out * 4)
                             + 2 * h_tile_b + small_b)

    # ---- pass 1: full-batch BN statistics -> folded (scale, shift) ----
    stats = pl.pallas_call(
        functools.partial(_stats_kernel, n_rows=float(n)),
        out_shape=jax.ShapeDtypeStruct((2, hid), jnp.float32),
        grid_spec=pltpu.PrefetchScalarGridSpec(
            num_scalar_prefetch=0,
            grid=(nt,),
            in_specs=[
                pl.BlockSpec((tile_n, d_in), lambda t: (t, 0)),   # x tile (pipelined)
                pl.BlockSpec((d_in, hid), lambda t: (0, 0)),      # w1 resident
                pl.BlockSpec((3, hid), lambda t: (0, 0)),         # packed b1/gamma/beta
            ],
            out_specs=pl.BlockSpec((2, hid), lambda t: (0, 0)),   # (scale, shift)
            scratch_shapes=[pltpu.VMEM((1, hid), jnp.float32),    # sum(h)
                            pltpu.VMEM((1, hid), jnp.float32)],   # sum(h*h)
        ),
        compiler_params=pltpu.CompilerParams(
            dimension_semantics=("arbitrary",),
            vmem_limit_bytes=stats_vmem),
    )(x_c, w1_c, params)

    # ---- pass 2: independent per-tile epilogue ('parallel' -> 2 TCs on v7x) ----
    out = pl.pallas_call(
        _apply_kernel,
        out_shape=jax.ShapeDtypeStruct((n, d_out), jnp.float32),
        grid_spec=pltpu.PrefetchScalarGridSpec(
            num_scalar_prefetch=0,
            grid=(nt,),
            in_specs=[
                pl.BlockSpec((tile_n, d_in), lambda t: (t, 0)),
                pl.BlockSpec((d_in, hid), lambda t: (0, 0)),
                pl.BlockSpec((hid, d_out), lambda t: (0, 0)),
                pl.BlockSpec((3, hid), lambda t: (0, 0)),
                pl.BlockSpec((2, hid), lambda t: (0, 0)),
            ],
            out_specs=pl.BlockSpec((tile_n, d_out), lambda t: (t, 0)),
        ),
        compiler_params=pltpu.CompilerParams(
            dimension_semantics=("parallel",),
            vmem_limit_bytes=apply_vmem),
    )(x_c, w1_c, w2_c, params, stats)
    return out


def reference(x, w1_t, b1, gamma, beta, w2_t, *, matmul_dtype=jnp.float32):
    """Pure-JAX reference matching the PyTorch module (training-mode BatchNorm1d)."""
    xc = x.astype(matmul_dtype)
    w1c = w1_t.astype(matmul_dtype)
    w2c = w2_t.astype(matmul_dtype)
    h = jnp.dot(xc, w1c, preferred_element_type=jnp.float32) + b1[None, :]
    mean = jnp.mean(h, axis=0, keepdims=True)
    var = jnp.mean((h - mean) ** 2, axis=0, keepdims=True)        # biased variance
    h = (h - mean) * jax.lax.rsqrt(var + _BN_EPS) * gamma[None, :] + beta[None, :]
    h = jnp.maximum(h, 0.0)
    z = jnp.dot(h.astype(matmul_dtype), w2c, preferred_element_type=jnp.float32)
    norm = jnp.sqrt(jnp.sum(z * z, axis=1, keepdims=True))
    return z / jnp.maximum(norm, _L2_EPS)


if __name__ == "__main__":
    # Small, lane-dense shapes consistent with the module (defaults 1280 -> 1280 -> 128):
    # feature dims are multiples of 128 (unmasked stores, full MXU columns); N is tiled by 128.
    N, D_IN, HID, D_OUT = 256, 256, 256, 128

    key = jax.random.PRNGKey(0)
    kx, kw1, kb1, kw2 = jax.random.split(key, 4)

    x = jax.random.normal(kx, (N, D_IN), dtype=jnp.float32)

    # PyTorch-like initialization scales; weights pre-transposed for row-major matmuls.
    w1_t = jax.random.uniform(kw1, (D_IN, HID), minval=-1.0, maxval=1.0,
                              dtype=jnp.float32) / jnp.sqrt(D_IN)
    b1 = jax.random.uniform(kb1, (HID,), minval=-1.0, maxval=1.0,
                            dtype=jnp.float32) / jnp.sqrt(D_IN)
    gamma = jnp.ones((HID,), dtype=jnp.float32)    # BatchNorm1d weight init
    beta = jnp.zeros((HID,), dtype=jnp.float32)    # BatchNorm1d bias init
    w2_t = jax.random.uniform(kw2, (HID, D_OUT), minval=-1.0, maxval=1.0,
                              dtype=jnp.float32) / jnp.sqrt(HID)

    out = projection_head(x, w1_t, b1, gamma, beta, w2_t)
    out = jax.block_until_ready(out)
    assert out.shape == (N, D_OUT)

    # Tight check against a reference that mirrors the kernel's bf16 MXU operands.
    ref_bf16 = reference(x, w1_t, b1, gamma, beta, w2_t, matmul_dtype=jnp.bfloat16)
    assert jnp.allclose(out, ref_bf16, atol=1e-3, rtol=1e-3), \
        "mismatch vs bf16-operand reference"

    # Loose check against the exact f32 PyTorch-semantics reference.
    ref_f32 = reference(x, w1_t, b1, gamma, beta, w2_t, matmul_dtype=jnp.float32)
    assert jnp.allclose(out, ref_f32, atol=2e-2, rtol=2e-2), \
        "mismatch vs f32 reference"

    print("KERNEL_OK")
</pallas_src>

<mosaic_0001>
module attributes {stable_mosaic.version = 11 : i64} {
  func.func @_stats_kernel(%arg0: i32, %arg1: memref<128x256xbf16, #tpu.memory_space<vmem>>, %arg2: memref<256x256xbf16, #tpu.memory_space<vmem>>, %arg3: memref<3x256xf32, #tpu.memory_space<vmem>>, %arg4: memref<2x256xf32, #tpu.memory_space<vmem>>, %arg5: memref<1x256xf32, #tpu.memory_space<vmem>>, %arg6: memref<1x256xf32, #tpu.memory_space<vmem>>) attributes {dimension_semantics = [#tpu.dimension_semantics<arbitrary>], iteration_bounds = array<i64: 2>, scalar_prefetch = 0 : i64, scratch_operands = 2 : i64, tpu.core_type = #tpu.core_type<tc>, window_params = [{transform_indices = @transform_0, window_bounds = array<i64: 128, 256>}, {pipeline_mode = #tpu.pipeline_mode<synchronous>, transform_indices = @transform_1, window_bounds = array<i64: 256, 256>}, {pipeline_mode = #tpu.pipeline_mode<synchronous>, transform_indices = @transform_2, window_bounds = array<i64: 3, 256>}, {pipeline_mode = #tpu.pipeline_mode<synchronous>, transform_indices = @transform_3, window_bounds = array<i64: 2, 256>}]} {
    %c0_i32 = arith.constant 0 : i32
    %0 = arith.cmpi eq, %arg0, %c0_i32 : i32
    %1 = arith.extui %0 : i1 to i32
    %c0_i32_0 = arith.constant 0 : i32
    %2 = arith.cmpi ne, %1, %c0_i32_0 : i32
    scf.if %2 {
      %cst_17 = arith.constant 0.000000e+00 : f32
      %23 = vector.broadcast %cst_17 : f32 to vector<1x256xf32>
      %c0_18 = arith.constant 0 : index
      %c0_19 = arith.constant 0 : index
      %24 = vector.load %arg5[%c0_18, %c0_19] : memref<1x256xf32, #tpu.memory_space<vmem>>, vector<1x256xf32>
      tpu.vector_store %arg5[%c0_18, %c0_19], %23 {strides = array<i32>} : memref<1x256xf32, #tpu.memory_space<vmem>>, vector<1x256xf32>,
      %cst_20 = arith.constant 0.000000e+00 : f32
      %25 = vector.broadcast %cst_20 : f32 to vector<1x256xf32>
      %c0_21 = arith.constant 0 : index
      %c0_22 = arith.constant 0 : index
      %26 = vector.load %arg6[%c0_21, %c0_22] : memref<1x256xf32, #tpu.memory_space<vmem>>, vector<1x256xf32>
      tpu.vector_store %arg6[%c0_21, %c0_22], %25 {strides = array<i32>} : memref<1x256xf32, #tpu.memory_space<vmem>>, vector<1x256xf32>,
    } else {
    }
    %c0 = arith.constant 0 : index
    %c0_1 = arith.constant 0 : index
    %3 = vector.load %arg3[%c0, %c0_1] : memref<3x256xf32, #tpu.memory_space<vmem>>, vector<1x256xf32>
    %c0_2 = arith.constant 0 : index
    %c0_3 = arith.constant 0 : index
    %4 = vector.load %arg1[%c0_2, %c0_3] : memref<128x256xbf16, #tpu.memory_space<vmem>>, vector<128x256xbf16>
    %c0_4 = arith.constant 0 : index
    %c0_5 = arith.constant 0 : index
    %5 = vector.load %arg2[%c0_4, %c0_5] : memref<256x256xbf16, #tpu.memory_space<vmem>>, vector<256x256xbf16>
    %cst = arith.constant dense<0.000000e+00> : vector<128x256xf32>
    %6 = tpu.matmul %4, %5, %cst {dimension_numbers = #tpu.dot_dimension_numbers<[1], [0], [0], [1], [0, 0, 1, 1], [], []>} : vector<128x256xbf16>, vector<256x256xbf16>, vector<128x256xf32> -> vector<128x256xf32>
    %7 = vector.broadcast %3 : vector<1x256xf32> to vector<128x256xf32>
    %8 = arith.addf %6, %7 : vector<128x256xf32>
    %c0_6 = arith.constant 0 : index
    %c0_7 = arith.constant 0 : index
    %9 = vector.load %arg5[%c0_6, %c0_7] : memref<1x256xf32, #tpu.memory_space<vmem>>, vector<1x256xf32>
    %cst_8 = arith.constant dense<0.000000e+00> : vector<256xf32>
    %10 = vector.multi_reduction <add>, %8, %cst_8 [0] : vector<128x256xf32> to vector<256xf32>
    %11 = vector.shape_cast %10 : vector<256xf32> to vector<1x256xf32>
    %12 = arith.addf %9, %11 : vector<1x256xf32>
    %c0_9 = arith.constant 0 : index
    %c0_10 = arith.constant 0 : index
    %13 = vector.load %arg5[%c0_9, %c0_10] : memref<1x256xf32, #tpu.memory_space<vmem>>, vector<1x256xf32>
    tpu.vector_store %arg5[%c0_9, %c0_10], %12 {strides = array<i32>} : memref<1x256xf32, #tpu.memory_space<vmem>>, vector<1x256xf32>,
    %c0_11 = arith.constant 0 : index
    %c0_12 = arith.constant 0 : index
    %14 = vector.load %arg6[%c0_11, %c0_12] : memref<1x256xf32, #tpu.memory_space<vmem>>, vector<1x256xf32>
    %15 = arith.mulf %8, %8 : vector<128x256xf32>
    %cst_13 = arith.constant dense<0.000000e+00> : vector<256xf32>
    %16 = vector.multi_reduction <add>, %15, %cst_13 [0] : vector<128x256xf32> to vector<256xf32>
    %17 = vector.shape_cast %16 : vector<256xf32> to vector<1x256xf32>
    %18 = arith.addf %14, %17 : vector<1x256xf32>
    %c0_14 = arith.constant 0 : index
    %c0_15 = arith.constant 0 : index
    %19 = vector.load %arg6[%c0_14, %c0_15] : memref<1x256xf32, #tpu.memory_space<vmem>>, vector<1x256xf32>
    tpu.vector_store %arg6[%c0_14, %c0_15], %18 {strides = array<i32>} : memref<1x256xf32, #tpu.memory_space<vmem>>, vector<1x256xf32>,
    %c1_i32 = arith.constant 1 : i32
    %20 = arith.cmpi eq, %arg0, %c1_i32 : i32
    %21 = arith.extui %20 : i1 to i32
    %c0_i32_16 = arith.constant 0 : i32
    %22 = arith.cmpi ne, %21, %c0_i32_16 : i32
    scf.if %22 {
      %c0_17 = arith.constant 0 : index
      %c0_18 = arith.constant 0 : index
      %23 = vector.load %arg5[%c0_17, %c0_18] : memref<1x256xf32, #tpu.memory_space<vmem>>, vector<1x256xf32>
      %cst_19 = arith.constant 3.906250e-03 : f32
      %24 = vector.broadcast %cst_19 : f32 to vector<1x256xf32>
      %25 = arith.mulf %23, %24 : vector<1x256xf32>
      %c0_20 = arith.constant 0 : index
      %c0_21 = arith.constant 0 : index
      %26 = vector.load %arg6[%c0_20, %c0_21] : memref<1x256xf32, #tpu.memory_space<vmem>>, vector<1x256xf32>
      %cst_22 = arith.constant 3.906250e-03 : f32
      %27 = vector.broadcast %cst_22 : f32 to vector<1x256xf32>
      %28 = arith.mulf %26, %27 : vector<1x256xf32>
      %29 = arith.mulf %25, %25 : vector<1x256xf32>
      %30 = arith.subf %28, %29 : vector<1x256xf32>
      %cst_23 = arith.constant 0.000000e+00 : f32
      %31 = vector.broadcast %cst_23 : f32 to vector<1x256xf32>
      %32 = arith.maximumf %30, %31 : vector<1x256xf32>
      %c1 = arith.constant 1 : index
      %c0_24 = arith.constant 0 : index
      %33 = vector.load %arg3[%c1, %c0_24] : memref<3x256xf32, #tpu.memory_space<vmem>>, vector<1x256xf32>
      %c2 = arith.constant 2 : index
      %c0_25 = arith.constant 0 : index
      %34 = vector.load %arg3[%c2, %c0_25] : memref<3x256xf32, #tpu.memory_space<vmem>>, vector<1x256xf32>
      %cst_26 = arith.constant 9.99999974E-6 : f32
      %35 = vector.broadcast %cst_26 : f32 to vector<1x256xf32>
      %36 = arith.addf %32, %35 : vector<1x256xf32>
      %37 = math.rsqrt %36 : vector<1x256xf32>
      %38 = arith.mulf %33, %37 : vector<1x256xf32>
      %39 = arith.mulf %25, %38 : vector<1x256xf32>
      %40 = arith.subf %34, %39 : vector<1x256xf32>
      %c0_27 = arith.constant 0 : index
      %c0_28 = arith.constant 0 : index
      %41 = vector.load %arg4[%c0_27, %c0_28] : memref<2x256xf32, #tpu.memory_space<vmem>>, vector<1x256xf32>
      tpu.vector_store %arg4[%c0_27, %c0_28], %38 {strides = array<i32>} : memref<2x256xf32, #tpu.memory_space<vmem>>, vector<1x256xf32>,
      %c1_29 = arith.constant 1 : index
      %c0_30 = arith.constant 0 : index
      %42 = vector.load %arg4[%c1_29, %c0_30] : memref<2x256xf32, #tpu.memory_space<vmem>>, vector<1x256xf32>
      tpu.vector_store %arg4[%c1_29, %c0_30], %40 {strides = array<i32>} : memref<2x256xf32, #tpu.memory_space<vmem>>, vector<1x256xf32>,
    } else {
    }
    return
  }
  func.func @transform_0(%arg0: i32) -> (i32, i32) {
    %c0_i32 = arith.constant 0 : i32
    %c0_i32_0 = arith.constant 0 : i32
    return %arg0, %c0_i32 : i32, i32
  }
  func.func @transform_1(%arg0: i32) -> (i32, i32) {
    %c0_i32 = arith.constant 0 : i32
    %c0_i32_0 = arith.constant 0 : i32
    %c0_i32_1 = arith.constant 0 : i32
    return %c0_i32, %c0_i32_0 : i32, i32
  }
  func.func @transform_2(%arg0: i32) -> (i32, i32) {
    %c0_i32 = arith.constant 0 : i32
    %c0_i32_0 = arith.constant 0 : i32
    %c0_i32_1 = arith.constant 0 : i32
    return %c0_i32, %c0_i32_0 : i32, i32
  }
  func.func @transform_3(%arg0: i32) -> (i32, i32) {
    %c0_i32 = arith.constant 0 : i32
    %c0_i32_0 = arith.constant 0 : i32
    %c0_i32_1 = arith.constant 0 : i32
    return %c0_i32, %c0_i32_0 : i32, i32
  }
}

</mosaic_0001>

<bundles_post_ra>
// kernel: tpu_custom_call.1
= control target key start
LH: loop header
LB: loop body
LE: loop exit
PB: predicated region body
PF: predicated region fallthrough
CT: control target
= control target key end

     0   :  { %8 = vsyncpa [#allocation5], 0  ;;  %s1632_s0 = inlined_call_operand.hbm [shape: bf16[256,256], index: 0, kind: input, shape index: {}]   ;;  %s1633_s1 = inlined_call_operand.hbm [shape: bf16[256,256], index: 1, kind: input, shape index: {}]   ;;  %s1634_s2 = inlined_call_operand.hbm [shape: f32[3,256], index: 2, kind: input, shape index: {}]   ;;  %s1635_s3 = inlined_call_operand.hbm [shape: f32[2,256], index: 3, kind: output, shape index: {}]  }
   0x1   :  { %10 = vsyncpa [#allocation5 + $0x1], 0 }
   0x2   :  { %11 = vsyncpa [#allocation8], 0 }
   0x3   :  { %12 = vsyncpa [#allocation6], 0  ;;  %s1320_s12 = smov 0   ;;  %s1322_s13 = smov 0  }
   0x4   :  { %s1324_s14 = smov 0   ;;  %s1326_s15 = smov 0  }
   0x5 LB: > { %s1339_s16 = sadd.s32 4294967295, %s1290_s15   ;;  %p38_p0 = scmp.ne.s32.totalorder %s1282_s13, %s1278_s12  ;;  %s1290_s15 = sphi %s1326_s15, %s1653_s15   ;;  %s1286_s14 = sphi %s1324_s14, %s1652_s14   ;;  %s1282_s13 = sphi %s1322_s13, %s1651_s13   ;;  %s1278_s12 = sphi %s1320_s12, %s1650_s12  }
   0x6   : > { %p1636_p1 = scmp.eq.s32.totalorder %s1339_s16, 0  ;;  %p891_p2 = scmp.ge.s32.totalorder %s1290_s15, 1 }
   0x7   : > { %p112_p3 = scmp.lt.s32.totalorder %s1290_s15, 3  ;;  %s1292_s19 = smov [#allocation7]  }
   0x8   : > { %p1348_p5 = por %p1636_p1, %p38_p0  ;;  %s124_s20 = sshll.u32 %s1292_s19, 4  ;;  %s125_s20 = int_to_ptr.vmem [resolvable:$true] %s124_s20 }
   0x9   : > { %p1352_p6 = pnand %p891_p2, %p112_p3  ;;  %s1293_s22 = smov [#allocation9]  }
   0xa   : > { %s1639_s17 = scalar_select %p1348_p5, 1, 0 }
   0xb   : > { %s1640_s18 = scalar_select %p1352_p6, 1, 0 }
   0xc   : > { %p1005_p7 = pneg %p1352_p6  ;;  %s138_s23 = sshll.u32 %s1293_s22, 4  ;;  %s1364_s23 = int_to_ptr.vmem [resolvable:$true] %s138_s23 }
   0xd   : > { %s1136_s26 = scalar_lea.hbm %s1633_s1, 4096 }
   0xe   : > { %p1360_p8 = pnand %p1005_p7, %p1636_p1  ;;  %p1137_p9 = scmp.ne.s32.totalorder %s1633_s1, %s1136_s26 }
   0xf   : > { %p1143_p13 = scmp.lt.u32.totalorder %s1136_s26, %s1633_s1 }
  0x10   : > { %p1138_p10 = pneg %p1360_p8 }
  0x12   : > { %p1139_p11 = pnand %p1138_p10, %p1137_p9 }
  0x14   : > { %p1140_p12 = pneg %p1139_p11 }
  0x16   : > { %p1145_p0 = pnand %p1143_p13, %p1140_p12 }
  0x18   : > { %1148 = shalt.err (!%p1145_p0)
}
  0x19   : > { %s1149_s4 = scalar_lea.vmem %s125_s20, 4096  ;;  %p1157_p4 = scmp.lt.s32.totalorder %s125_s20, %s125_s20 }
  0x1a   : > { %p1150_p2 = scmp.ne.s32.totalorder %s125_s20, %s1149_s4  ;;  %p1158_p1 = scmp.lt.s32.totalorder %s1149_s4, %s1149_s4 }
  0x1c   : > { %p1152_p3 = pnand %p1150_p2, %p1138_p10  ;;  %p1159_p5 = por %p1158_p1, %p1157_p4 }
  0x1e   : > { %p1153_p7 = pneg %p1152_p3 }
  0x20   : > { %p1160_p6 = pnand %p1159_p5, %p1153_p7 }
  0x22   : > { %1163 = shalt.err (!%p1160_p6)
}
  0x23   : > { %s1294_s5 = smov 128   ;;  %s1295_s6 = smov 8  }
  0x24   : > { %1008 = dma.hbm_to_vmem [thread:$0]  (!%p1360_p8), %s1633_s1, 4096, %s125_s20, [#allocation8], %s1294_s5, %s1294_s5, %s1295_s6  }
  0x25   : > { %s1164_s11 = scalar_lea.hbm %s1634_s2, 128 }
  0x26   : > { %p1165_p1 = scmp.ne.s32.totalorder %s1634_s2, %s1164_s11  ;;  %p1171_p6 = scmp.lt.u32.totalorder %s1164_s11, %s1634_s2 }
  0x28   : > { %p1167_p4 = pnand %p1165_p1, %p1138_p10 }
  0x2a   : > { %p1168_p5 = pneg %p1167_p4 }
  0x2c   : > { %p1173_p9 = pnand %p1171_p6, %p1168_p5 }
  0x2e   : > { %1176 = shalt.err (!%p1173_p9)
}
  0x2f   : > { %s1177_s20 = scalar_lea.vmem %s1364_s23, 128  ;;  %p1185_p0 = scmp.lt.s32.totalorder %s1364_s23, %s1364_s23 }
  0x30   : > { %p1178_p11 = scmp.ne.s32.totalorder %s1364_s23, %s1177_s20  ;;  %p1186_p2 = scmp.lt.s32.totalorder %s1177_s20, %s1177_s20 }
  0x32   : > { %p1180_p12 = pnand %p1178_p11, %p1138_p10  ;;  %p1187_p3 = por %p1186_p2, %p1185_p0 }
  0x34   : > { %p1181_p13 = pneg %p1180_p12 }
  0x36   : > { %p1188_p7 = pnand %p1187_p3, %p1181_p13 }
  0x38   : > { %1191 = shalt.err (!%p1188_p7)
}
  0x39   : > { %1011 = dma.hbm_to_vmem [thread:$0]  (!%p1360_p8), %s1634_s2, 128, %s1364_s23, [#allocation8]  }
  0x3a   : > { %s1417_s27 = sadd.s32 1, %s1290_s15   ;;  %s25_s28 = sadd.s32 1, %s1286_s14 }
  0x3b   : > { %s22_s21 = ssub.s32 %s1290_s15, %s1417_s27  ;;  %p32_p10 = scmp.ne.s32.totalorder %s1286_s14, %s1282_s13 }
  0x3c   : > { %p23_p1 = scmp.eq.s32.totalorder %s22_s21, 0  ;;  %p33_p4 = scmp.eq.s32.totalorder %s1290_s15, 0 }
  0x3d   : > { %p1018_p5 = scmp.lt.s32.totalorder %s1290_s15, 2  ;;  %s149_s29 = sand.u32 1, %s1286_s14  }
  0x3e   : > { %s1428_s30 = scalar_select %p23_p1, %s1286_s14, %s25_s28  }
  0x3f   : > { %p34_p6 = por %p33_p4, %p32_p10  ;;  %s895_s4 = sshll.u32 %s149_s29, 7 }
  0x40   : > { %s958_s7 = sshll.u32 %s1290_s15, 11  ;;  %s153_s23 = scalar_lea.vmem [#allocation4], %s895_s4 }
  0x41   : > { %s1434_s10 = scalar_lea.hbm %s1632_s0, %s958_s7  ;;  %s161_s11 = sshll.u32 %s153_s23, 4  ;;  %s1440_s11 = int_to_ptr.vmem [resolvable:$true] %s161_s11 }
  0x42   : > { %p1436_p8 = pnand %p1018_p5, %p34_p6  ;;  %s1442_s15 = scalar_lea.sflag [#allocation5], %s149_s29 }
  0x43   : > { %s1192_s19 = scalar_lea.hbm %s1434_s10, 2048  ;;  %s1197_s20 = scalar_lea.hbm %s1632_s0, 4096 }
  0x44   : > { %p1193_p9 = scmp.ne.s32.totalorder %s1434_s10, %s1192_s19  ;;  %p1194_p11 = pneg %p1436_p8 }
  0x45   : > { %p1198_p0 = scmp.lt.u32.totalorder %s1434_s10, %s1632_s0  ;;  %p1199_p2 = scmp.lt.u32.totalorder %s1197_s20, %s1192_s19 }
  0x46   : > { %p1195_p12 = pnand %p1194_p11, %p1193_p9  ;;  %p1201_p7 = scmp.lt.u32.totalorder %s1192_s19, %s1434_s10 }
  0x47   : > { %p1200_p3 = por %p1199_p2, %p1198_p0 }
  0x48   : > { %p1196_p13 = pneg %p1195_p12 }
  0x49   : > { %p1202_p10 = por %p1201_p7, %p1200_p3 }
  0x4b   : > { %p1203_p1 = pnand %p1202_p10, %p1196_p13 }
  0x4d   : > { %1206 = shalt.err (!%p1203_p1)
}
  0x4e   : > { %s1207_s28 = scalar_lea.vmem %s1440_s11, 2048  ;;  %s1296_s21 = smov [#allocation4]  }
  0x4f   : > { %p1208_p4 = scmp.ne.s32.totalorder %s1440_s11, %s1207_s28  ;;  %s1212_s29 = sshll.u32 %s1296_s21, 4  ;;  %s1213_s29 = int_to_ptr.vmem [resolvable:$false] %s1212_s29 }
  0x50   : > { %s1214_s4 = scalar_lea.vmem %s1213_s29, 4096  ;;  %p1215_p9 = scmp.lt.s32.totalorder %s1440_s11, %s1213_s29 }
  0x51   : > { %p1210_p5 = pnand %p1208_p4, %p1194_p11  ;;  %p1216_p12 = scmp.lt.s32.totalorder %s1214_s4, %s1207_s28 }
  0x53   : > { %p1211_p6 = pneg %p1210_p5  ;;  %p1217_p0 = por %p1216_p12, %p1215_p9 }
  0x55   : > { %p1218_p2 = pnand %p1217_p0, %p1211_p6 }
  0x57   : > { %1221 = shalt.err (!%p1218_p2)
}
  0x58   : > { %1015 = dma.hbm_to_vmem [thread:$0]  (!%p1436_p8), %s1434_s10, 2048, %s1440_s11, %s1442_s15, %s1294_s5, %s1294_s5, %s1295_s6  }
  0x59   : > { %p1643_p11 = scmp.ne.s32.totalorder %s1640_s18, 0 }
  0x5a   : > { %s175_s7 = sand.u32 (!%p1643_p11), 1, %s1282_s13   ;;  %p1644_p13 = scmp.ne.s32.totalorder (!%p1643_p11), %s1639_s17, 0 }
  0x5b   : > { %173 = sbr.rel (%p1643_p11) target bundleno = 516 (0x204), region = 32  ;;  %s900_s8 = sshll.u32 (!%p1643_p11), %s175_s7, 7 }
  0x5c   : > { %s176_s9 = scalar_lea.sflag (!%p1643_p11), [#allocation5], %s175_s7  ;;  %s1476_s23 = scalar_lea.vmem (!%p1643_p11), [#allocation4], %s900_s8 }
  0x62   : > { %1265 = dma.done.wait (%p1644_p13), %s176_s9, 2048  }
  0x63   : > { %1267 = vsyncadd (%p1644_p13), %s176_s9, 4294965248  ;;  %p1645_p3 = scmp.eq.s32.totalorder %s1339_s16, 0 }
  0x65   : > { %1269 = dma.done.wait (%p1645_p3), [#allocation8], 4224   ;;  %p1646_p8 = pmov %p1645_p3 }
  0x66   : > { %p1647_p7 = scmp.ne.s32.totalorder %s1339_s16, 0 }
  0x67   : > { %1271 = vsyncadd (%p1646_p8), [#allocation8], 4294963072  ;;  %v210_v0 = vlaneseq (!%p1647_p7)  ;;  %v1297_v1 = vmov (!%p1647_p7), 0.0  }
  0x68   : > { %209 = sbr.rel (%p1647_p7) target bundleno = 111 (0x6f), region = 48 }
  0x69   : > { %vm212_vm0 = vcmp.lt.s32.totalorder (!%p1647_p7), %v210_v0, 256 }
  0x6a   : > { %214 = vst.msk [vmem:[#allocation2] sm:$0x3] (!%p1647_p7), %vm212_vm0, %v1297_v1  ;;  %215 = vst.msk [vmem:[#allocation3] sm:$0x3] (!%p1647_p7), %vm212_vm0, %v1297_v1 }
  0x6f PF: > { %v1062_v2 = vld [vmem:[#allocation7 + $0x4] ss:$8 sps:$4 sm:$0xff]   ;;  %v1064_v3 = vld [vmem:[#allocation7] ss:$8 sps:$4 sm:$0xff]   ;;  %v1065_v4 = vld [vmem:[#allocation7 + $0x14] ss:$8 sps:$4 sm:$0xff]   ;;  %v266_v50 = vlaneseq }
  0x70   : > { %516 = vmatprep.subr.bf16.mxu0 %v1062_v2  ;;  %959 = vmatprep.subr.bf16.mxu1 %v1062_v2  ;;  %v1067_v5 = vld [vmem:[#allocation7 + $0x10] ss:$8 sps:$4 sm:$0xff]   ;;  %v1068_v6 = vld [vmem:[#allocation7 + $0x24] ss:$8 sps:$4 sm:$0xff]   ;;  %v1070_v7 = vld [vmem:[#allocation7 + $0x20] ss:$8 sps:$4 sm:$0xff]  }
  0x71   : > { %517 = vmatpush1.bf16.msra.mxu0 %v1064_v3  ;;  %975 = vmatpush1.bf16.msra.mxu1 %v1064_v3  ;;  %v1071_v8 = vld [vmem:[#allocation7 + $0x34] ss:$8 sps:$4 sm:$0xff]   ;;  %v1073_v9 = vld [vmem:[#allocation7 + $0x30] ss:$8 sps:$4 sm:$0xff]   ;;  %v1074_v10 = vld [vmem:[#allocation7 + $0x44] ss:$8 sps:$4 sm:$0xff]  }
  0x72   : > { %518 = vmatprep.subr.bf16.mxu0 %v1065_v4  ;;  %960 = vmatprep.subr.bf16.mxu1 %v1065_v4  ;;  %v1076_v11 = vld [vmem:[#allocation7 + $0x40] ss:$8 sps:$4 sm:$0xff]   ;;  %v1077_v12 = vld [vmem:[#allocation7 + $0x54] ss:$8 sps:$4 sm:$0xff]   ;;  %v1079_v13 = vld [vmem:[#allocation7 + $0x50] ss:$8 sps:$4 sm:$0xff]  }
  0x73   : > { %v1080_v14 = vld [vmem:[#allocation7 + $0x64] ss:$8 sps:$4 sm:$0xff]   ;;  %v1082_v16 = vld [vmem:[#allocation7 + $0x60] ss:$8 sps:$4 sm:$0xff]   ;;  %v1083_v17 = vld [vmem:[#allocation7 + $0x74] ss:$8 sps:$4 sm:$0xff]  }
  0x74   : > { %v1112_v15 = vld [vmem:[%s1476_s23 + $0x4] ss:$8 sps:$4 sm:$0xff]   ;;  %v1085_v19 = vld [vmem:[#allocation7 + $0x70] ss:$8 sps:$4 sm:$0xff]   ;;  %v1088_v21 = vld [vmem:[#allocation7 + $0x80] ss:$8 sps:$4 sm:$0xff]  }
  0x75   : > { %519 = vmatpush1.bf16.msra.mxu0 %v1067_v5  ;;  %976 = vmatpush1.bf16.msra.mxu1 %v1067_v5  ;;  %v1118_v18 = vld [vmem:[%s1476_s23 + $0x44] ss:$8 sps:$4 sm:$0xff]   ;;  %v1089_v22 = vld [vmem:[#allocation7 + $0x94] ss:$8 sps:$4 sm:$0xff]   ;;  %v1091_v23 = vld [vmem:[#allocation7 + $0x90] ss:$8 sps:$4 sm:$0xff]  }
  0x76   : > { %520 = vmatprep.subr.bf16.mxu0 %v1068_v6  ;;  %961 = vmatprep.subr.bf16.mxu1 %v1068_v6  ;;  %v1086_v20 = vld [vmem:[#allocation7 + $0x84] ss:$8 sps:$4 sm:$0xff]   ;;  %v1094_v25 = vld [vmem:[#allocation7 + $0xa0] ss:$8 sps:$4 sm:$0xff]   ;;  %v1095_v26 = vld [vmem:[#allocation7 + $0xb4] ss:$8 sps:$4 sm:$0xff]  }
  0x77   : > { %548 = vmatprep.mubr.bf16.mxu0 %v1112_v15  ;;  %588 = vmatprep.mubr.bf16.mxu1 %v1118_v18  ;;  %v1092_v24 = vld [vmem:[#allocation7 + $0xa4] ss:$8 sps:$4 sm:$0xff]   ;;  %v1097_v27 = vld [vmem:[#allocation7 + $0xb0] ss:$8 sps:$4 sm:$0xff]   ;;  %v1100_v29 = vld [vmem:[#allocation7 + $0xc0] ss:$8 sps:$4 sm:$0xff]  }
  0x78   : > { %v1098_v28 = vld [vmem:[#allocation7 + $0xc4] ss:$8 sps:$4 sm:$0xff]   ;;  %v1101_v30 = vld [vmem:[#allocation7 + $0xd4] ss:$8 sps:$4 sm:$0xff]   ;;  %v1103_v31 = vld [vmem:[#allocation7 + $0xd0] ss:$8 sps:$4 sm:$0xff]  }
  0x79   : > { %521 = vmatpush1.bf16.msra.mxu0 %v1070_v7  ;;  %977 = vmatpush1.bf16.msra.mxu1 %v1070_v7  ;;  %v1104_v32 = vld [vmem:[#allocation7 + $0xe4] ss:$8 sps:$4 sm:$0xff]   ;;  %v1106_v33 = vld [vmem:[#allocation7 + $0xe0] ss:$8 sps:$4 sm:$0xff]   ;;  %v1107_v34 = vld [vmem:[#allocation7 + $0xf4] ss:$8 sps:$4 sm:$0xff]  }
  0x7a   : > { %522 = vmatprep.subr.bf16.mxu0 %v1071_v8  ;;  %962 = vmatprep.subr.bf16.mxu1 %v1071_v8  ;;  %v1109_v35 = vld [vmem:[#allocation7 + $0xf0] ss:$8 sps:$4 sm:$0xff]   ;;  %v1110_v36 = vld [vmem:[%s1476_s23] ss:$8 sps:$4 sm:$0xff]   ;;  %v1113_v38 = vld [vmem:[%s1476_s23 + $0x14] ss:$8 sps:$4 sm:$0xff]  }
  0x7b   : > { %v1116_v37 = vld [vmem:[%s1476_s23 + $0x40] ss:$8 sps:$4 sm:$0xff]   ;;  %v1122_v39 = vld [vmem:[%s1476_s23 + $0x54] ss:$8 sps:$4 sm:$0xff]   ;;  %v1115_v40 = vld [vmem:[%s1476_s23 + $0x10] ss:$8 sps:$4 sm:$0xff]  }
  0x7c   : > { %v1124_v41 = vld [vmem:[%s1476_s23 + $0x50] ss:$8 sps:$4 sm:$0xff]   ;;  %v1119_v42 = vld [vmem:[%s1476_s23 + $0x24] ss:$8 sps:$4 sm:$0xff]   ;;  %v1121_v44 = vld [vmem:[%s1476_s23 + $0x20] ss:$8 sps:$4 sm:$0xff]  }
  0x7d   : > { %523 = vmatpush1.bf16.msra.mxu0 %v1073_v9  ;;  %978 = vmatpush1.bf16.msra.mxu1 %v1073_v9  ;;  %v1128_v43 = vld [vmem:[%s1476_s23 + $0x64] ss:$8 sps:$4 sm:$0xff]   ;;  %v1130_v45 = vld [vmem:[%s1476_s23 + $0x60] ss:$8 sps:$4 sm:$0xff]   ;;  %v1125_v46 = vld [vmem:[%s1476_s23 + $0x34] ss:$8 sps:$4 sm:$0xff]  }
  0x7e   : > { %524 = vmatprep.subr.bf16.mxu0 %v1074_v10  ;;  %963 = vmatprep.subr.bf16.mxu1 %v1074_v10  ;;  %v1131_v47 = vld [vmem:[%s1476_s23 + $0x74] ss:$8 sps:$4 sm:$0xff]   ;;  %v1127_v48 = vld [vmem:[%s1476_s23 + $0x30] ss:$8 sps:$4 sm:$0xff]   ;;  %v1505_v51 = vshrl.u32 %v266_v50, 7  ;;  %vm1583_vm1 = vcmp.lt.s32.totalorder %v266_v50, 256 }
  0x7f   : > { %v1133_v49 = vld [vmem:[%s1476_s23 + $0x70] ss:$8 sps:$4 sm:$0xff]   ;;  %v216_v53 = vld [vmem:[#allocation9] ss:$4 sm:$0x3]  ;;  %p952_p10 = scmp.ne.s32.totalorder %s1339_s16, 1 }
  0x80   : > { %v268_v52 = vsub.s32 0, %v1505_v51  ;;  %v272_v54 = vsub.s32 1, %v1505_v51 }
  0x81   : > { %525 = vmatpush1.bf16.msra.mxu0 %v1076_v11  ;;  %979 = vmatpush1.bf16.msra.mxu1 %v1076_v11 }
  0x82   : > { %526 = vmatprep.subr.bf16.mxu0 %v1077_v12  ;;  %964 = vmatprep.subr.bf16.mxu1 %v1077_v12  ;;  %v1509_v55 = vrot.slane %v216_v53, %v268_v52  ;;  %v1511_v56 = vrot.slane %v216_v53, %v272_v54 }
  0x85   : > { %527 = vmatpush1.bf16.msra.mxu0 %v1079_v13  ;;  %980 = vmatpush1.bf16.msra.mxu1 %v1079_v13 }
  0x86   : > { %528 = vmatprep.subr.bf16.mxu0 %v1080_v14  ;;  %965 = vmatprep.subr.bf16.mxu1 %v1080_v14 }
  0x89   : > { %529 = vmatpush1.bf16.msra.mxu0 %v1082_v16  ;;  %981 = vmatpush1.bf16.msra.mxu1 %v1082_v16 }
  0x8a   : > { %530 = vmatprep.subr.bf16.mxu0 %v1083_v17  ;;  %966 = vmatprep.subr.bf16.mxu1 %v1083_v17 }
  0x8d   : > { %531 = vmatpush1.bf16.msra.mxu0 %v1085_v19  ;;  %982 = vmatpush1.bf16.msra.mxu1 %v1085_v19 }
  0x8e   : > { %532 = vmatprep.subr.bf16.mxu0 %v1086_v20  ;;  %967 = vmatprep.subr.bf16.mxu1 %v1086_v20 }
  0x91   : > { %533 = vmatpush1.bf16.msra.mxu0 %v1088_v21  ;;  %983 = vmatpush1.bf16.msra.mxu1 %v1088_v21 }
  0x92   : > { %534 = vmatprep.subr.bf16.mxu0 %v1089_v22  ;;  %968 = vmatprep.subr.bf16.mxu1 %v1089_v22 }
  0x95   : > { %535 = vmatpush1.bf16.msra.mxu0 %v1091_v23  ;;  %984 = vmatpush1.bf16.msra.mxu1 %v1091_v23 }
  0x96   : > { %536 = vmatprep.subr.bf16.mxu0 %v1092_v24  ;;  %969 = vmatprep.subr.bf16.mxu1 %v1092_v24 }
  0x99   : > { %537 = vmatpush1.bf16.msra.mxu0 %v1094_v25  ;;  %985 = vmatpush1.bf16.msra.mxu1 %v1094_v25 }
  0x9a   : > { %538 = vmatprep.subr.bf16.mxu0 %v1095_v26  ;;  %970 = vmatprep.subr.bf16.mxu1 %v1095_v26 }
  0x9d   : > { %539 = vmatpush1.bf16.msra.mxu0 %v1097_v27  ;;  %986 = vmatpush1.bf16.msra.mxu1 %v1097_v27 }
  0x9e   : > { %540 = vmatprep.subr.bf16.mxu0 %v1098_v28  ;;  %971 = vmatprep.subr.bf16.mxu1 %v1098_v28 }
  0xa1   : > { %541 = vmatpush1.bf16.msra.mxu0 %v1100_v29  ;;  %987 = vmatpush1.bf16.msra.mxu1 %v1100_v29 }
  0xa2   : > { %542 = vmatprep.subr.bf16.mxu0 %v1101_v30  ;;  %972 = vmatprep.subr.bf16.mxu1 %v1101_v30 }
  0xa5   : > { %543 = vmatpush1.bf16.msra.mxu0 %v1103_v31  ;;  %988 = vmatpush1.bf16.msra.mxu1 %v1103_v31 }
  0xa6   : > { %544 = vmatprep.subr.bf16.mxu0 %v1104_v32  ;;  %973 = vmatprep.subr.bf16.mxu1 %v1104_v32 }
  0xa9   : > { %545 = vmatpush1.bf16.msra.mxu0 %v1106_v33  ;;  %989 = vmatpush1.bf16.msra.mxu1 %v1106_v33 }
  0xaa   : > { %546 = vmatprep.subr.bf16.mxu0 %v1107_v34  ;;  %974 = vmatprep.subr.bf16.mxu1 %v1107_v34 }
  0xad   : > { %547 = vmatpush1.bf16.msra.mxu0 %v1109_v35  ;;  %990 = vmatpush1.bf16.msra.mxu1 %v1109_v35 }
  0xb0   : > { %549 = vmatmul.mubr.bf16.vlgmr.msra.gmra.mrb[0].mxu0 %v1110_v36  ;;  %589 = vmatmul.mubr.bf16.vlgmr.msra.gmra.mrb[0].mxu1 %v1116_v37 }
  0xb1   : > { %558 = vmatprep.mubr.bf16.mxu0 %v1113_v38  ;;  %598 = vmatprep.mubr.bf16.mxu1 %v1122_v39 }
  0xb8   : > { %559 = vmatmul.mubr.bf16.gmra.mrb[4].mxu0 %v1115_v40  ;;  %599 = vmatmul.mubr.bf16.gmra.mrb[4].mxu1 %v1124_v41 }
  0xb9   : > { %568 = vmatprep.mubr.bf16.mxu0 %v1119_v42  ;;  %608 = vmatprep.mubr.bf16.mxu1 %v1128_v43 }
  0xc0   : > { %569 = vmatmul.mubr.bf16.gmra.mrb[8].mxu0 %v1121_v44  ;;  %609 = vmatmul.mubr.bf16.gmra.mrb[8].mxu1 %v1130_v45 }
  0xc1   : > { %578 = vmatprep.mubr.bf16.mxu0 %v1125_v46  ;;  %618 = vmatprep.mubr.bf16.mxu1 %v1131_v47 }
  0xc8   : > { %579 = vmatmul.mubr.bf16.gmra.mrb[12].mxu0 %v1127_v48  ;;  %619 = vmatmul.mubr.bf16.gmra.mrb[12].mxu1 %v1133_v49 }
 0x183   : > { %v550_v57 = vpop.f32.mrb[0].mxu0  ;;  %v1513_v58 = vpop.f32.mrb[0].mxu1 }
 0x184   : > { %v551_v59 = vadd.f32 %v550_v57, %v1509_v55  ;;  %v552_v60 = vpop.f32.mrb[1].mxu0  ;;  %v1516_v61 = vpop.f32.mrb[1].mxu1 }
 0x185   : > { %v553_v62 = vadd.f32 %v552_v60, %v1511_v56  ;;  %v554_v63 = vpop.f32.mrb[2].mxu0  ;;  %v1519_v0 = vpop.f32.mrb[2].mxu1 }
 0x186   : > { %v555_v1 = vadd.f32 %v554_v63, %v1509_v55  ;;  %v556_v2 = vpop.f32.mrb[3].mxu0  ;;  %v1522_v3 = vpop.f32.mrb[3].mxu1  ;;  %v697_v5 = vmul.f32 %v551_v59, %v551_v59 }
 0x187   : > { %v557_v4 = vadd.f32 %v556_v2, %v1511_v56  ;;  %v698_v8 = vmul.f32 %v553_v62, %v553_v62 }
 0x188   : > { %v630_v6 = vadd.f32 %v555_v1, %v551_v59  ;;  %v699_v7 = vmul.f32 %v555_v1, %v555_v1 }
 0x189   : > { %v651_v9 = vadd.f32 %v557_v4, %v553_v62  ;;  %v700_v10 = vmul.f32 %v557_v4, %v557_v4 }
 0x18a   : > { %v729_v11 = vadd.f32 %v699_v7, %v697_v5 }
 0x18b   : > { %v750_v12 = vadd.f32 %v700_v10, %v698_v8  ;;  %v560_v13 = vpop.f32.mrb[4].mxu0  ;;  %v1525_v14 = vpop.f32.mrb[4].mxu1  ;;  %v591_v10 = vadd.f32 %v1513_v58, %v1509_v55 }
 0x18c   : > { %v561_v15 = vadd.f32 %v560_v13, %v1509_v55  ;;  %v562_v16 = vpop.f32.mrb[5].mxu0  ;;  %v1528_v17 = vpop.f32.mrb[5].mxu1 }
 0x18d   : > { %v563_v18 = vadd.f32 %v562_v16, %v1511_v56  ;;  %v564_v19 = vpop.f32.mrb[6].mxu0  ;;  %v1531_v20 = vpop.f32.mrb[6].mxu1  ;;  %v595_v16 = vadd.f32 %v1519_v0, %v1509_v55  ;;  %v603_v0 = vadd.f32 %v1528_v17, %v1511_v56 }
 0x18e   : > { %v631_v21 = vadd.f32 %v630_v6, %v561_v15  ;;  %v701_v22 = vmul.f32 %v561_v15, %v561_v15  ;;  %v565_v23 = vadd.f32 %v564_v19, %v1509_v55  ;;  %v566_v24 = vpop.f32.mrb[7].mxu0  ;;  %v1534_v25 = vpop.f32.mrb[7].mxu1 }
 0x18f   : > { %v652_v26 = vadd.f32 %v651_v9, %v563_v18  ;;  %v702_v27 = vmul.f32 %v563_v18, %v563_v18  ;;  %v567_v28 = vadd.f32 %v566_v24, %v1511_v56  ;;  %v597_v24 = vadd.f32 %v1522_v3, %v1511_v56 }
 0x190   : > { %v730_v29 = vadd.f32 %v729_v11, %v701_v22  ;;  %v632_v30 = vadd.f32 %v631_v21, %v565_v23  ;;  %v703_v31 = vmul.f32 %v565_v23, %v565_v23  ;;  %v593_v11 = vadd.f32 %v1516_v61, %v1511_v56 }
 0x191   : > { %v751_v32 = vadd.f32 %v750_v12, %v702_v27  ;;  %v653_v33 = vadd.f32 %v652_v26, %v567_v28  ;;  %v704_v34 = vmul.f32 %v567_v28, %v567_v28  ;;  %v601_v27 = vadd.f32 %v1525_v14, %v1509_v55 }
 0x192   : > { %v731_v35 = vadd.f32 %v730_v29, %v703_v31  ;;  %v605_v14 = vadd.f32 %v1531_v20, %v1509_v55  ;;  %v607_v17 = vadd.f32 %v1534_v25, %v1511_v56 }
 0x193   : > { %v752_v36 = vadd.f32 %v751_v32, %v704_v34  ;;  %v570_v37 = vpop.f32.mrb[8].mxu0  ;;  %v1537_v38 = vpop.f32.mrb[8].mxu1  ;;  %v713_v34 = vmul.f32 %v591_v10, %v591_v10 }
 0x194   : > { %v571_v39 = vadd.f32 %v570_v37, %v1509_v55  ;;  %v572_v40 = vpop.f32.mrb[9].mxu0  ;;  %v1540_v41 = vpop.f32.mrb[9].mxu1  ;;  %v715_v37 = vmul.f32 %v595_v16, %v595_v16 }
 0x195   : > { %v573_v42 = vadd.f32 %v572_v40, %v1511_v56  ;;  %v574_v43 = vpop.f32.mrb[10].mxu0  ;;  %v1543_v44 = vpop.f32.mrb[10].mxu1 }
 0x196   : > { %v633_v45 = vadd.f32 %v632_v30, %v571_v39  ;;  %v705_v46 = vmul.f32 %v571_v39, %v571_v39  ;;  %v575_v47 = vadd.f32 %v574_v43, %v1509_v55  ;;  %v576_v48 = vpop.f32.mrb[11].mxu0  ;;  %v1546_v49 = vpop.f32.mrb[11].mxu1  ;;  %v716_v39 = vmul.f32 %v597_v24, %v597_v24 }
 0x197   : > { %v654_v52 = vadd.f32 %v653_v33, %v573_v42  ;;  %v706_v53 = vmul.f32 %v573_v42, %v573_v42  ;;  %v577_v54 = vadd.f32 %v576_v48, %v1511_v56  ;;  %v717_v43 = vmul.f32 %v601_v27, %v601_v27 }
 0x198   : > { %v732_v57 = vadd.f32 %v731_v35, %v705_v46  ;;  %v634_v59 = vadd.f32 %v633_v45, %v575_v47  ;;  %v707_v60 = vmul.f32 %v575_v47, %v575_v47  ;;  %v714_v35 = vmul.f32 %v593_v11, %v593_v11 }
 0x199   : > { %v753_v62 = vadd.f32 %v752_v36, %v706_v53  ;;  %v655_v63 = vadd.f32 %v654_v52, %v577_v54  ;;  %v708_v1 = vmul.f32 %v577_v54, %v577_v54  ;;  %v718_v47 = vmul.f32 %v603_v0, %v603_v0 }
 0x19a   : > { %v733_v2 = vadd.f32 %v732_v57, %v707_v60  ;;  %v611_v54 = vadd.f32 %v1537_v38, %v1509_v55  ;;  %v615_v20 = vadd.f32 %v1543_v44, %v1509_v55 }
 0x19b   : > { %v754_v4 = vadd.f32 %v753_v62, %v708_v1  ;;  %v580_v5 = vpop.f32.mrb[12].mxu0  ;;  %v620_v6 = vpop.f32.mrb[12].mxu1  ;;  %v719_v1 = vmul.f32 %v605_v14, %v605_v14 }
 0x19c   : > { %v581_v7 = vadd.f32 %v580_v5, %v1509_v55  ;;  %v582_v8 = vpop.f32.mrb[13].mxu0  ;;  %v622_v9 = vpop.f32.mrb[13].mxu1  ;;  %v720_v5 = vmul.f32 %v607_v17, %v607_v17  ;;  %v723_v44 = vmul.f32 %v615_v20, %v615_v20 }
 0x19d   : > { %v583_v12 = vadd.f32 %v582_v8, %v1511_v56  ;;  %v584_v13 = vpop.f32.mrb[14].mxu0  ;;  %v624_v15 = vpop.f32.mrb[14].mxu1  ;;  %v623_v8 = vadd.f32 %v622_v9, %v1511_v56 }
 0x19e   : > { %v635_v18 = vadd.f32 %v634_v59, %v581_v7  ;;  %v709_v19 = vmul.f32 %v581_v7, %v581_v7  ;;  %v585_v21 = vadd.f32 %v584_v13, %v1509_v55  ;;  %v586_v22 = vpop.f32.mrb[15].mxu0  ;;  %v626_v23 = vpop.f32.mrb[15].mxu1  ;;  %v613_v59 = vadd.f32 %v1540_v41, %v1511_v56 }
 0x19f   : > { %v656_v58 = vadd.f32 %v655_v63, %v583_v12  ;;  %v710_v26 = vmul.f32 %v583_v12, %v583_v12  ;;  %v587_v61 = vadd.f32 %v586_v22, %v1511_v56  ;;  %v617_v63 = vadd.f32 %v1546_v49, %v1511_v56 }
 0x1a0   : > { %v734_v28 = vadd.f32 %v733_v2, %v709_v19  ;;  %v636_v29 = vadd.f32 %v635_v18, %v585_v21  ;;  %v711_v30 = vmul.f32 %v585_v21, %v585_v21  ;;  %v721_v41 = vmul.f32 %v611_v54, %v611_v54 }
 0x1a1   : > { %v755_v31 = vadd.f32 %v754_v4, %v710_v26  ;;  %v657_v32 = vadd.f32 %v656_v58, %v587_v61  ;;  %v712_v33 = vmul.f32 %v587_v61, %v587_v61  ;;  %v621_v4 = vadd.f32 %v620_v6, %v1509_v55 }
 0x1a2   : > { %v637_v36 = vadd.f32 %v636_v29, %v591_v10  ;;  %v735_v3 = vadd.f32 %v734_v28, %v711_v30  ;;  %v722_v12 = vmul.f32 %v613_v59, %v613_v59  ;;  %v724_v18 = vmul.f32 %v617_v63, %v617_v63 }
 0x1a3   : > { %v658_v40 = vadd.f32 %v657_v32, %v593_v11  ;;  %v756_v42 = vadd.f32 %v755_v31, %v712_v33  ;;  %v725_v21 = vmul.f32 %v621_v4, %v621_v4  ;;  %v625_v22 = vadd.f32 %v624_v15, %v1509_v55 }
 0x1a4   : > { %v638_v45 = vadd.f32 %v637_v36, %v595_v16  ;;  %v736_v46 = vadd.f32 %v735_v3, %v713_v34  ;;  %v726_v58 = vmul.f32 %v623_v8, %v623_v8  ;;  %v627_v26 = vadd.f32 %v626_v23, %v1511_v56 }
 0x1a5   : > { %v659_v48 = vadd.f32 %v658_v40, %v597_v24  ;;  %v757_v52 = vadd.f32 %v756_v42, %v714_v35 }
 0x1a6   : > { %v737_v53 = vadd.f32 %v736_v46, %v715_v37  ;;  %v639_v57 = vadd.f32 %v638_v45, %v601_v27  ;;  %v728_v33 = vmul.f32 %v627_v26, %v627_v26 }
 0x1a7   : > { %v758_v60 = vadd.f32 %v757_v52, %v716_v39  ;;  %v660_v62 = vadd.f32 %v659_v48, %v603_v0  ;;  %v727_v0 = vmul.f32 %v625_v22, %v625_v22  ;;  %v1298_v39 = vmov 1966171168  }
 0x1a8   : > { %v640_v25 = vadd.f32 %v639_v57, %v605_v14  ;;  %v738_v2 = vadd.f32 %v737_v53, %v717_v43  ;;  %v676_v40 = vunpack.c.l.s4 %v1298_v39 }
 0x1a9   : > { %v661_v7 = vadd.f32 %v660_v62, %v607_v17  ;;  %v759_v38 = vadd.f32 %v758_v60, %v718_v47 }
 0x1aa   : > { %v641_v10 = vadd.f32 %v640_v25, %v611_v54  ;;  %v739_v11 = vadd.f32 %v738_v2, %v719_v1  ;;  %v677_v17 = vunpack.c.0.s8 %v676_v40 }
 0x1ab   : > { %v662_v13 = vadd.f32 %v661_v7, %v613_v59  ;;  %v760_v16 = vadd.f32 %v759_v38, %v720_v5  ;;  %v629_v7 = vld [vmem:[#allocation2] sm:$0x3] }
 0x1ac   : > { %v740_v19 = vadd.f32 %v739_v11, %v721_v41  ;;  %v642_v49 = vadd.f32 %v641_v10, %v615_v20  ;;  %v680_v20 = vsub.s32 %v677_v17, %v1505_v51  ;;  %v696_v41 = vld [vmem:[#allocation3] sm:$0x3] }
 0x1ad   : > { %v761_v24 = vadd.f32 %v760_v16, %v722_v12  ;;  %v663_v6 = vadd.f32 %v662_v13, %v617_v63 }
 0x1ae   : > { %v741_v61 = vadd.f32 %v740_v19, %v723_v44  ;;  %v643_v9 = vadd.f32 %v642_v49, %v621_v4 }
 0x1af   : > { %v762_v27 = vadd.f32 %v761_v24, %v724_v18  ;;  %v664_v28 = vadd.f32 %v663_v6, %v623_v8 }
 0x1b0   : > { %v742_v29 = vadd.f32 %v741_v61, %v725_v21  ;;  %v644_v30 = vadd.f32 %v643_v9, %v625_v22  ;;  %v803_v22 = vld [vmem:[#allocation9 + $0x1] ss:$4 sm:$0x3] (!%p952_p10) }
 0x1b1   : > { %v763_v31 = vadd.f32 %v762_v27, %v726_v58  ;;  %v665_v32 = vadd.f32 %v664_v28, %v627_v26  ;;  %v805_v58 = vld [vmem:[#allocation9 + $0x2] ss:$4 sm:$0x3] (!%p952_p10) }
 0x1b2   : > { %v645_v34 = vrot.slane %v644_v30, 4  ;;  %v743_v35 = vadd.f32 %v742_v29, %v727_v0 }
 0x1b3   : > { %v666_v36 = vrot.slane %v665_v32, 4  ;;  %v764_v3 = vadd.f32 %v763_v31, %v728_v33 }
 0x1b4   : > { %v646_v55 = vadd.f32 %v645_v34, %v644_v30  ;;  %v744_v15 = vrot.slane %v743_v35, 4 }
 0x1b5   : > { %v667_v37 = vadd.f32 %v666_v36, %v665_v32  ;;  %v765_v56 = vrot.slane %v764_v3, 4 }
 0x1b6   : > { %v647_v23 = vrot.slane %v646_v55, 2  ;;  %v745_v42 = vadd.f32 %v744_v15, %v743_v35 }
 0x1b7   : > { %v668_v43 = vrot.slane %v667_v37, 2  ;;  %v766_v14 = vadd.f32 %v765_v56, %v764_v3 }
 0x1b8   : > { %v648_v45 = vadd.f32 %v647_v23, %v646_v55  ;;  %v746_v46 = vrot.slane %v745_v42, 2 }
 0x1b9   : > { %v669_v47 = vadd.f32 %v668_v43, %v667_v37  ;;  %v767_v48 = vrot.slane %v766_v14, 2 }
 0x1ba   : > { %v649_v52 = vrot.slane %v648_v45, 1  ;;  %v747_v53 = vadd.f32 %v746_v46, %v745_v42 }
 0x1bb   : > { %v670_v54 = vrot.slane %v669_v47, 1  ;;  %v768_v57 = vadd.f32 %v767_v48, %v766_v14 }
 0x1bc   : > { %v650_v59 = vadd.f32 %v649_v52, %v648_v45  ;;  %v748_v60 = vrot.slane %v747_v53, 1 }
 0x1bd   : > { %v671_v62 = vadd.f32 %v670_v54, %v669_v47  ;;  %v769_v63 = vrot.slane %v768_v57, 1 }
 0x1be   : > { %v749_v1 = vadd.f32 %v748_v60, %v747_v53 }
 0x1bf   : > { %v674_v25 = vcombine.low %v650_v59, %v671_v62  ;;  %v770_v2 = vadd.f32 %v769_v63, %v768_v57 }
 0x1c1   : > { %v681_v4 = vrot.slane %v674_v25, %v680_v20  ;;  %v773_v5 = vcombine.low %v749_v1, %v770_v2 }
 0x1c3   : > { %v688_v38 = vrot.slane %v681_v4, %v680_v20  ;;  %v780_v8 = vrot.slane %v773_v5, %v680_v20  ;;  %794 = sbr.rel (%p952_p10) target bundleno = 491 (0x1eb), region = 52 }
 0x1c5   : > { %v690_v11 = vadd.f32 %v688_v38, %v629_v7  ;;  %v787_v12 = vrot.slane %v780_v8, %v680_v20 }
 0x1c7   : > { %695 = vst.msk [vmem:[#allocation2] sm:$0x3] %vm1583_vm1, %v690_v11  ;;  %v789_v51 = vadd.f32 %v787_v12, %v696_v41 }
 0x1c9   : > { %790 = vst.msk [vmem:[#allocation3] sm:$0x3] %vm1583_vm1, %v789_v51 }
 0x1ce   : > { %v795_v13 = vld [vmem:[#allocation2] sm:$0x3] }
 0x1cf   : > { %v796_v44 = vmul.f32 0.00390625, %v795_v13 }
 0x1d0   : > { %v797_v16 = vld [vmem:[#allocation3] sm:$0x3] }
 0x1d1   : > { %v798_v50 = vmul.f32 0.00390625, %v797_v16  ;;  %v799_v18 = vmul.f32 %v796_v44, %v796_v44 }
 0x1d3   : > { %v800_v19 = vsub.f32 %v798_v50, %v799_v18 }
 0x1d5   : > { %v801_v49 = vmax.f32 %v800_v19, 0.0 }
 0x1d7   : > { %v806_v21 = vadd.f32 1e-05, %v801_v49 }
 0x1d9   : > { %1134 = vrsqrt.f32 %v806_v21 }
 0x1e3   : > { %v1135_v24 = vpop.eup %1134 }
 0x1e4   : > { %v808_v6 = vmul.f32 %v1135_v24, %v803_v22 }
 0x1e6   : > { %811 = vst.msk [vmem:[#allocation10] ss:$2 sm:$0x3] %vm1583_vm1, %v808_v6  ;;  %v809_v26 = vmul.f32 %v808_v6, %v796_v44 }
 0x1e8   : > { %v810_v61 = vsub.f32 %v805_v58, %v809_v26 }
 0x1ea   : > { %813 = vst.msk [vmem:[#allocation10 + $0x1] ss:$2 sm:$0x3] %vm1583_vm1, %v810_v61 }
 0x1eb PF: > { %p1021_p1 = scmp.eq.s32.totalorder %s1339_s16, 1  ;;  %s1299_s17 = smov [#allocation10]  }
 0x1ec   : > { %s821_s18 = sshll.u32 %s1299_s17, 4  ;;  %s822_s18 = int_to_ptr.vmem [resolvable:$true] %s821_s18 }
 0x1ed   : > { %s1222_s5 = scalar_lea.vmem %s822_s18, 64  ;;  %p1229_p9 = scmp.lt.s32.totalorder %s822_s18, %s822_s18 }
 0x1ee   : > { %p1223_p4 = scmp.ne.s32.totalorder %s822_s18, %s1222_s5  ;;  %p1230_p12 = scmp.lt.s32.totalorder %s1222_s5, %s1222_s5 }
 0x1f0   : > { %p1224_p5 = pnand %p1223_p4, %p1021_p1  ;;  %p1231_p0 = por %p1230_p12, %p1229_p9 }
 0x1f2   : > { %p1225_p6 = pneg %p1224_p5 }
 0x1f4   : > { %p1232_p2 = pnand %p1231_p0, %p1225_p6 }
 0x1f6   : > { %1235 = shalt.err (!%p1232_p2)
}
 0x1f7   : > { %s1236_s11 = scalar_lea.hbm %s1635_s3, 64 }
 0x1f8   : > { %p1237_p11 = scmp.ne.s32.totalorder %s1635_s3, %s1236_s11  ;;  %p1242_p8 = scmp.lt.u32.totalorder %s1236_s11, %s1635_s3 }
 0x1fa   : > { %p1238_p13 = pnand %p1237_p11, %p1021_p1 }
 0x1fc   : > { %p1239_p3 = pneg %p1238_p13 }
 0x1fe   : > { %p1244_p7 = pnand %p1242_p8, %p1239_p3 }
 0x200   : > { %1247 = shalt.err (!%p1244_p7)
}
 0x201   : > { %1002 = dma.vmem_to_hbm [thread:$0]  (%p1021_p1), %s822_s18, 64, %s1635_s3, [#allocation6]  }
 0x202   : > { %1273 = dma.done.wait (%p1021_p1), [#allocation6], 64  }
 0x203   : > { %1275 = vsyncadd (%p1021_p1), [#allocation6], 4294967232 }
 0x204 PF: > { %p15_p10 = scmp.ge.s32.totalorder %s1417_s27, 4   ;;  %s1650_s12 = smov %s1282_s13 }
 0x205   : > { %s1651_s13 = smov %s1286_s14  ;;  %s1652_s14 = smov %s1428_s30 }
 0x206   : > { %s1653_s15 = smov %s1417_s27  ;;  %17 = sbr.rel (!%p15_p10) target bundleno = 5 (0x5), region = 88 }
 0x20d   :  { %834 = vsyncpa [#allocation5], 1 }
 0x20e   :  { %836 = vsyncpa [#allocation5 + $0x1], 1 }
 0x20f   :  { %837 = vsyncpa [#allocation8], 1 }
 0x210   :  { %838 = vsyncpa [#allocation6], 1 }
 0x211   :  { %840 = vsyncpa [#allocation6 + $0x1], 1 }

</bundles_post_ra>
